<compile_context>
chip_gen: v7x
topology: tpu7x:2x2x1
jax: 0.10.0
libtpu: 0.0.40
codegen_flags: <defaults>
</compile_context>

<pallas_src>
import functools

import jax
import jax.numpy as jnp
from jax import lax
from jax.experimental import pallas as pl
from jax.experimental.pallas import tpu as pltpu


def _mha_kernel(x_ref, wq_ref, wkv_ref, bq_ref, bkv_ref, wo_ref, bo_ref,
                o_ref, acc_ref, kv_ref, *, head_dim, group_heads, q_tile):
    qi = pl.program_id(1)
    g = pl.program_id(2)
    num_groups = pl.num_programs(2)
    gdh = group_heads * head_dim

    # K/V projection for this (batch, head-group): computed once per batch row-slab at
    # qi == 0 and cached in VMEM bf16 across query tiles.  Fused K|V weight slab makes this
    # a single lane-dense matmul of width 2*G*Dh.
    @pl.when(qi == 0)
    def _():
        x_all = x_ref[0]                                                    # (S, E) bf16
        kv = jnp.dot(x_all, wkv_ref[g], preferred_element_type=jnp.float32)
        kv = kv + bkv_ref[g]                                                # (S, 2*GDh) f32
        kv_ref[g] = kv.astype(jnp.bfloat16)

    # Q projection for this query tile; 1/sqrt(Dh) folded into q (one (tq, GDh) multiply).
    row0 = pl.multiple_of(qi * q_tile, q_tile)
    xq = x_ref[0, pl.ds(row0, q_tile), :]                                   # (tq, E) bf16
    q = jnp.dot(xq, wq_ref[g], preferred_element_type=jnp.float32) + bq_ref[g]
    q = (q * (1.0 / head_dim ** 0.5)).astype(jnp.bfloat16)                  # (tq, GDh)

    kv = kv_ref[g]                                                          # (S, 2*GDh) bf16

    # Score / softmax / PV per head within the group (statically unrolled, G is small).
    head_outs = []
    for h in range(group_heads):
        lo = h * head_dim
        qh = q[:, lo:lo + head_dim]                                         # (tq, Dh)
        kh = kv[:, lo:lo + head_dim]                                        # (S,  Dh)
        vh = kv[:, gdh + lo:gdh + lo + head_dim]                            # (S,  Dh)
        # scores = qh @ kh^T, contracting last dims directly (no explicit transpose).
        scores = lax.dot_general(qh, kh, dimension_numbers=(((1,), (1,)), ((), ())),
                                 preferred_element_type=jnp.float32)        # (tq, S) f32
        # torch.clamp(+-1e9) then nan_to_num: after the clip the posinf/neginf branches are
        # dead, so a single select handles the NaN case.
        scores = jnp.where(jnp.isnan(scores), 0.0, jnp.clip(scores, -1e9, 1e9))
        scores = scores - jnp.max(scores, axis=-1, keepdims=True)
        e = jnp.exp(scores)
        attn = e * pl.reciprocal(jnp.sum(e, axis=-1, keepdims=True), approx=True) + 1e-9
        head_outs.append(jnp.dot(attn.astype(jnp.bfloat16), vh,
                                 preferred_element_type=jnp.float32).astype(jnp.bfloat16))

    group_out = head_outs[0] if group_heads == 1 else jnp.concatenate(head_outs, axis=-1)

    # This group's slab of the output projection (lane-dense: N = E).
    contrib = jnp.dot(group_out, wo_ref[g], preferred_element_type=jnp.float32)  # (tq, E)

    @pl.when(g == 0)
    def _():
        acc_ref[...] = contrib                    # first-iteration write, no zero fill

    @pl.when(g > 0)
    def _():
        acc_ref[...] += contrib

    @pl.when(g == num_groups - 1)
    def _():
        o_ref[0] = (acc_ref[...] + bo_ref[...]).astype(o_ref.dtype)


def _pick_group_heads(num_heads, head_dim, target_lanes=128):
    """Smallest divisor G of num_heads with G*head_dim >= target_lanes (else all heads)."""
    for g in range(1, num_heads + 1):
        if num_heads % g == 0 and g * head_dim >= target_lanes:
            return g
    return num_heads


def multi_head_attention(x, w_qkv, b_qkv, w_out, b_out, *, num_heads, q_block=None):
    """x: (B, S, E).  w_qkv: (E, 3E) (in,out layout), b_qkv: (3E,), w_out: (E, E), b_out: (E,)."""
    B, S, E = x.shape
    assert E % num_heads == 0
    H = num_heads
    Dh = E // H
    G = _pick_group_heads(H, Dh)     # heads per grid step -> lane-dense projections
    NG = H // G
    GDh = G * Dh

    tq = S if q_block is None else q_block
    assert S % tq == 0 and (tq == S or tq % 16 == 0), \
        "query tile must divide S and be 16-aligned (bf16 sublane packing)"
    QT = S // tq

    # ---- Host-side repack into per-group, lane-aligned slabs (bf16 weights, f32 biases).
    # w_qkv columns are [Q | K | V]; within each third, group j owns cols [j*GDh:(j+1)*GDh].
    w4 = w_qkv.reshape(E, 3, NG, GDh)
    w_q = jnp.transpose(w4[:, 0], (1, 0, 2)).astype(jnp.bfloat16)           # (NG, E, GDh)
    w_k = jnp.transpose(w4[:, 1], (1, 0, 2))
    w_v = jnp.transpose(w4[:, 2], (1, 0, 2))
    w_kv = jnp.concatenate([w_k, w_v], axis=-1).astype(jnp.bfloat16)        # (NG, E, 2*GDh)

    b4 = b_qkv.reshape(3, NG, 1, GDh).astype(jnp.float32)
    b_q = b4[0]                                                             # (NG, 1, GDh)
    b_kv = jnp.concatenate([b4[1], b4[2]], axis=-1)                         # (NG, 1, 2*GDh)

    # out = sum_g group_out_g @ w_out[g*GDh:(g+1)*GDh, :]
    w_o = w_out.reshape(NG, GDh, E).astype(jnp.bfloat16)                    # (NG, GDh, E)
    b_o = b_out.reshape(1, E).astype(jnp.float32)                           # (1, E)

    x_bf16 = x.astype(jnp.bfloat16)   # halves the x HBM->VMEM DMA; f32 accumulation inside

    kernel = functools.partial(_mha_kernel, head_dim=Dh, group_heads=G, q_tile=tq)

    return pl.pallas_call(
        kernel,
        out_shape=jax.ShapeDtypeStruct((B, S, E), x.dtype),
        grid_spec=pltpu.PrefetchScalarGridSpec(
            num_scalar_prefetch=0,
            grid=(B, QT, NG),
            in_specs=[
                # x: full (S, E) row slab per batch (block index constant across qi, g so it
                # is DMA'd once per batch); the query tile is sliced in-kernel.
                pl.BlockSpec((1, S, E), lambda b, qi, g: (b, 0, 0)),
                # Grid-resident weights/biases (constant index map -> fetched once).
                pl.BlockSpec((NG, E, GDh),     lambda b, qi, g: (0, 0, 0)),   # W_q slabs
                pl.BlockSpec((NG, E, 2 * GDh), lambda b, qi, g: (0, 0, 0)),   # W_k|W_v fused
                pl.BlockSpec((NG, 1, GDh),     lambda b, qi, g: (0, 0, 0)),   # b_q slabs
                pl.BlockSpec((NG, 1, 2 * GDh), lambda b, qi, g: (0, 0, 0)),   # b_k|b_v fused
                pl.BlockSpec((NG, GDh, E),     lambda b, qi, g: (0, 0, 0)),   # W_out slabs
                pl.BlockSpec((1, E),           lambda b, qi, g: (0, 0)),      # b_out
            ],
            out_specs=pl.BlockSpec((1, tq, E), lambda b, qi, g: (b, qi, 0)),
            scratch_shapes=[
                pltpu.VMEM((tq, E), jnp.float32),              # out-proj accumulator
                pltpu.VMEM((NG, S, 2 * GDh), jnp.bfloat16),    # cached K|V per head-group
            ],
        ),
        # QT axis is "arbitrary": the qi == 0 K/V-cache fill must execute before qi > 0 on
        # the same core.  Batch stays "parallel" so megacore gets work when B >= 2.
        compiler_params=pltpu.CompilerParams(
            dimension_semantics=("parallel", "arbitrary", "arbitrary"),
            vmem_limit_bytes=64 * 1024 * 1024),
    )(x_bf16, w_q, w_kv, b_q, b_kv, w_o, b_o)


def _reference(x, w_qkv, b_qkv, w_out, b_out, *, num_heads):
    """Pure-JAX (f32) mirror of the PyTorch forward, for correctness checking."""
    B, S, E = x.shape
    Dh = E // num_heads
    qkv = x @ w_qkv + b_qkv
    q, k, v = jnp.split(qkv, 3, axis=-1)

    def split(t):  # (B, S, E) -> (B, H, S, Dh)
        return t.reshape(B, S, num_heads, Dh).transpose(0, 2, 1, 3)

    q, k, v = split(q), split(k), split(v)
    scores = (q @ jnp.swapaxes(k, -2, -1)) / (Dh ** 0.5)
    scores = jnp.clip(scores, -1e9, 1e9)
    scores = jnp.nan_to_num(scores, nan=0.0, posinf=1e9, neginf=-1e9)
    scores = scores - jnp.max(scores, axis=-1, keepdims=True)
    attn = jax.nn.softmax(scores, axis=-1) + 1e-9
    out = attn @ v                                                          # (B, H, S, Dh)
    out = out.transpose(0, 2, 1, 3).reshape(B, S, E)
    return out @ w_out + b_out


if __name__ == "__main__":
    B, S, E, H = 2, 8, 32, 4

    key = jax.random.PRNGKey(0)
    kx, k1, k2, k3, k4 = jax.random.split(key, 5)

    # Deterministic params mimicking nn.Linear's U(-1/sqrt(fan_in), 1/sqrt(fan_in)).
    bound = 1.0 / (E ** 0.5)
    x = jax.random.normal(kx, (B, S, E), dtype=jnp.float32)
    w_qkv = jax.random.uniform(k1, (E, 3 * E), jnp.float32, -bound, bound)   # (in, out)
    b_qkv = jax.random.uniform(k2, (3 * E,), jnp.float32, -bound, bound)
    w_out = jax.random.uniform(k3, (E, E), jnp.float32, -bound, bound)
    b_out = jax.random.uniform(k4, (E,), jnp.float32, -bound, bound)

    out = multi_head_attention(x, w_qkv, b_qkv, w_out, b_out, num_heads=H)
    out = jax.block_until_ready(out)

    ref = _reference(x, w_qkv, b_qkv, w_out, b_out, num_heads=H)
    assert out.shape == (B, S, E)
    # bf16 MXU operands (f32 accumulation) + approx reciprocal => small drift vs f32 reference.
    assert jnp.allclose(out, ref, atol=2e-2, rtol=2e-2), "mismatch vs reference"

    print("KERNEL_OK")
</pallas_src>

<mosaic_0001>
module attributes {stable_mosaic.version = 11 : i64} {
  func.func @_mha_kernel(%arg0: i32, %arg1: i32, %arg2: i32, %arg3: memref<1x8x32xbf16, #tpu.memory_space<vmem>>, %arg4: memref<1x32x32xbf16, #tpu.memory_space<vmem>>, %arg5: memref<1x32x64xbf16, #tpu.memory_space<vmem>>, %arg6: memref<1x1x32xf32, #tpu.memory_space<vmem>>, %arg7: memref<1x1x64xf32, #tpu.memory_space<vmem>>, %arg8: memref<1x32x32xbf16, #tpu.memory_space<vmem>>, %arg9: memref<1x32xf32, #tpu.memory_space<vmem>>, %arg10: memref<1x8x32xf32, #tpu.memory_space<vmem>>, %arg11: memref<8x32xf32, #tpu.memory_space<vmem>>, %arg12: memref<1x8x64xbf16, #tpu.memory_space<vmem>>) attributes {dimension_semantics = [#tpu.dimension_semantics<parallel>, #tpu.dimension_semantics<arbitrary>, #tpu.dimension_semantics<arbitrary>], iteration_bounds = array<i64: 2, 1, 1>, scalar_prefetch = 0 : i64, scratch_operands = 2 : i64, tpu.core_type = #tpu.core_type<tc>, window_params = [{transform_indices = @transform_0, window_bounds = array<i64: 1, 8, 32>}, {pipeline_mode = #tpu.pipeline_mode<synchronous>, transform_indices = @transform_1, window_bounds = array<i64: 1, 32, 32>}, {pipeline_mode = #tpu.pipeline_mode<synchronous>, transform_indices = @transform_2, window_bounds = array<i64: 1, 32, 64>}, {pipeline_mode = #tpu.pipeline_mode<synchronous>, transform_indices = @transform_3, window_bounds = array<i64: 1, 1, 32>}, {pipeline_mode = #tpu.pipeline_mode<synchronous>, transform_indices = @transform_4, window_bounds = array<i64: 1, 1, 64>}, {pipeline_mode = #tpu.pipeline_mode<synchronous>, transform_indices = @transform_5, window_bounds = array<i64: 1, 32, 32>}, {pipeline_mode = #tpu.pipeline_mode<synchronous>, transform_indices = @transform_6, window_bounds = array<i64: 1, 32>}, {transform_indices = @transform_7, window_bounds = array<i64: 1, 8, 32>}]} {
    %c0_i32 = arith.constant 0 : i32
    %0 = arith.cmpi eq, %arg1, %c0_i32 : i32
    %1 = arith.extui %0 : i1 to i32
    %c0_i32_0 = arith.constant 0 : i32
    %2 = arith.cmpi ne, %1, %c0_i32_0 : i32
    scf.if %2 {
      %c0_50 = arith.constant 0 : index
      %c0_51 = arith.constant 0 : index
      %c0_52 = arith.constant 0 : index
      %141 = vector.load %arg3[%c0_50, %c0_51, %c0_52] : memref<1x8x32xbf16, #tpu.memory_space<vmem>>, vector<1x8x32xbf16>
      %142 = vector.shape_cast %141 : vector<1x8x32xbf16> to vector<8x32xbf16>
      %143 = arith.index_cast %arg2 : i32 to index
      %c0_53 = arith.constant 0 : index
      %c0_54 = arith.constant 0 : index
      %144 = vector.load %arg5[%143, %c0_53, %c0_54] : memref<1x32x64xbf16, #tpu.memory_space<vmem>>, vector<1x32x64xbf16>
      %145 = vector.shape_cast %144 : vector<1x32x64xbf16> to vector<32x64xbf16>
      %cst_55 = arith.constant dense<0.000000e+00> : vector<8x64xf32>
      %146 = tpu.matmul %142, %145, %cst_55 {dimension_numbers = #tpu.dot_dimension_numbers<[1], [0], [0], [1], [0, 0, 1, 1], [], []>} : vector<8x32xbf16>, vector<32x64xbf16>, vector<8x64xf32> -> vector<8x64xf32>
      %147 = arith.index_cast %arg2 : i32 to index
      %c0_56 = arith.constant 0 : index
      %c0_57 = arith.constant 0 : index
      %148 = vector.load %arg7[%147, %c0_56, %c0_57] : memref<1x1x64xf32, #tpu.memory_space<vmem>>, vector<1x1x64xf32>
      %149 = vector.shape_cast %148 : vector<1x1x64xf32> to vector<1x64xf32>
      %150 = vector.broadcast %149 : vector<1x64xf32> to vector<8x64xf32>
      %151 = arith.addf %146, %150 : vector<8x64xf32>
      %152 = arith.truncf %151 : vector<8x64xf32> to vector<8x64xbf16>
      %153 = arith.index_cast %arg2 : i32 to index
      %c0_58 = arith.constant 0 : index
      %c0_59 = arith.constant 0 : index
      %154 = vector.load %arg12[%153, %c0_58, %c0_59] : memref<1x8x64xbf16, #tpu.memory_space<vmem>>, vector<1x8x64xbf16>
      %155 = vector.shape_cast %154 : vector<1x8x64xbf16> to vector<8x64xbf16>
      %156 = vector.shape_cast %152 : vector<8x64xbf16> to vector<1x8x64xbf16>
      tpu.vector_store %arg12[%153, %c0_58, %c0_59], %156 {strides = array<i32>} : memref<1x8x64xbf16, #tpu.memory_space<vmem>>, vector<1x8x64xbf16>,
    } else {
    }
    %c8_i32 = arith.constant 8 : i32
    %3 = arith.muli %arg1, %c8_i32 : i32
    %4 = tpu.assume_multiple %3, 8 : i32
    %c0 = arith.constant 0 : index
    %5 = arith.index_cast %4 : i32 to index
    %c0_1 = arith.constant 0 : index
    %6 = vector.load %arg3[%c0, %5, %c0_1] : memref<1x8x32xbf16, #tpu.memory_space<vmem>>, vector<1x8x32xbf16>
    %7 = vector.shape_cast %6 : vector<1x8x32xbf16> to vector<8x32xbf16>
    %8 = arith.index_cast %arg2 : i32 to index
    %c0_2 = arith.constant 0 : index
    %c0_3 = arith.constant 0 : index
    %9 = vector.load %arg4[%8, %c0_2, %c0_3] : memref<1x32x32xbf16, #tpu.memory_space<vmem>>, vector<1x32x32xbf16>
    %10 = vector.shape_cast %9 : vector<1x32x32xbf16> to vector<32x32xbf16>
    %cst = arith.constant dense<0.000000e+00> : vector<8x32xf32>
    %11 = tpu.matmul %7, %10, %cst {dimension_numbers = #tpu.dot_dimension_numbers<[1], [0], [0], [1], [0, 0, 1, 1], [], []>} : vector<8x32xbf16>, vector<32x32xbf16>, vector<8x32xf32> -> vector<8x32xf32>
    %12 = arith.index_cast %arg2 : i32 to index
    %c0_4 = arith.constant 0 : index
    %c0_5 = arith.constant 0 : index
    %13 = vector.load %arg6[%12, %c0_4, %c0_5] : memref<1x1x32xf32, #tpu.memory_space<vmem>>, vector<1x1x32xf32>
    %14 = vector.shape_cast %13 : vector<1x1x32xf32> to vector<1x32xf32>
    %15 = vector.broadcast %14 : vector<1x32xf32> to vector<8x32xf32>
    %16 = arith.addf %11, %15 : vector<8x32xf32>
    %cst_6 = arith.constant 0.353553385 : f32
    %17 = vector.broadcast %cst_6 : f32 to vector<8x32xf32>
    %18 = arith.mulf %16, %17 : vector<8x32xf32>
    %19 = arith.truncf %18 : vector<8x32xf32> to vector<8x32xbf16>
    %20 = arith.index_cast %arg2 : i32 to index
    %c0_7 = arith.constant 0 : index
    %c0_8 = arith.constant 0 : index
    %21 = vector.load %arg12[%20, %c0_7, %c0_8] : memref<1x8x64xbf16, #tpu.memory_space<vmem>>, vector<1x8x64xbf16>
    %22 = vector.shape_cast %21 : vector<1x8x64xbf16> to vector<8x64xbf16>
    %23 = vector.extract_strided_slice %19 {offsets = [0, 0], sizes = [8, 8], strides = [1, 1]} : vector<8x32xbf16> to vector<8x8xbf16>
    %24 = vector.extract_strided_slice %22 {offsets = [0, 0], sizes = [8, 8], strides = [1, 1]} : vector<8x64xbf16> to vector<8x8xbf16>
    %25 = vector.extract_strided_slice %22 {offsets = [0, 32], sizes = [8, 8], strides = [1, 1]} : vector<8x64xbf16> to vector<8x8xbf16>
    %cst_9 = arith.constant dense<0.000000e+00> : vector<8x8xf32>
    %26 = tpu.matmul %23, %24, %cst_9 {dimension_numbers = #tpu.dot_dimension_numbers<[1], [1], [0], [0], [0, 0, 1, 0], [], []>} : vector<8x8xbf16>, vector<8x8xbf16>, vector<8x8xf32> -> vector<8x8xf32>
    %27 = arith.cmpf one, %26, %26 : vector<8x8xf32>
    %cst_10 = arith.constant -1.000000e+09 : f32
    %cst_11 = arith.constant 1.000000e+09 : f32
    %28 = vector.broadcast %cst_10 : f32 to vector<8x8xf32>
    %29 = arith.maximumf %28, %26 : vector<8x8xf32>
    %30 = vector.broadcast %cst_11 : f32 to vector<8x8xf32>
    %31 = arith.minimumf %30, %29 : vector<8x8xf32>
    %cst_12 = arith.constant 0.000000e+00 : f32
    %32 = vector.broadcast %cst_12 : f32 to vector<8x8xf32>
    %33 = arith.select %27, %32, %31 : vector<8x8xi1>, vector<8x8xf32>
    %cst_13 = arith.constant dense<0xFF800000> : vector<8xf32>
    %34 = vector.multi_reduction <maximumf>, %33, %cst_13 [1] : vector<8x8xf32> to vector<8xf32>
    %35 = vector.shape_cast %34 : vector<8xf32> to vector<8x1xf32>
    %36 = vector.broadcast %35 : vector<8x1xf32> to vector<8x8xf32>
    %37 = arith.subf %33, %36 : vector<8x8xf32>
    %38 = math.exp %37 : vector<8x8xf32>
    %cst_14 = arith.constant dense<0.000000e+00> : vector<8xf32>
    %39 = vector.multi_reduction <add>, %38, %cst_14 [1] : vector<8x8xf32> to vector<8xf32>
    %40 = vector.shape_cast %39 : vector<8xf32> to vector<8x1xf32>
    %41 = tpu.reciprocal %40 {approx = true} : vector<8x1xf32> -> vector<8x1xf32>
    %42 = vector.broadcast %41 : vector<8x1xf32> to vector<8x8xf32>
    %43 = arith.mulf %38, %42 : vector<8x8xf32>
    %cst_15 = arith.constant 9.99999971E-10 : f32
    %44 = vector.broadcast %cst_15 : f32 to vector<8x8xf32>
    %45 = arith.addf %43, %44 : vector<8x8xf32>
    %46 = arith.truncf %45 : vector<8x8xf32> to vector<8x8xbf16>
    %cst_16 = arith.constant dense<0.000000e+00> : vector<8x8xf32>
    %47 = tpu.matmul %46, %25, %cst_16 {dimension_numbers = #tpu.dot_dimension_numbers<[1], [0], [0], [1], [0, 0, 1, 1], [], []>} : vector<8x8xbf16>, vector<8x8xbf16>, vector<8x8xf32> -> vector<8x8xf32>
    %48 = arith.truncf %47 : vector<8x8xf32> to vector<8x8xbf16>
    %49 = vector.extract_strided_slice %19 {offsets = [0, 8], sizes = [8, 8], strides = [1, 1]} : vector<8x32xbf16> to vector<8x8xbf16>
    %50 = vector.extract_strided_slice %22 {offsets = [0, 8], sizes = [8, 8], strides = [1, 1]} : vector<8x64xbf16> to vector<8x8xbf16>
    %51 = vector.extract_strided_slice %22 {offsets = [0, 40], sizes = [8, 8], strides = [1, 1]} : vector<8x64xbf16> to vector<8x8xbf16>
    %cst_17 = arith.constant dense<0.000000e+00> : vector<8x8xf32>
    %52 = tpu.matmul %49, %50, %cst_17 {dimension_numbers = #tpu.dot_dimension_numbers<[1], [1], [0], [0], [0, 0, 1, 0], [], []>} : vector<8x8xbf16>, vector<8x8xbf16>, vector<8x8xf32> -> vector<8x8xf32>
    %53 = arith.cmpf one, %52, %52 : vector<8x8xf32>
    %cst_18 = arith.constant -1.000000e+09 : f32
    %cst_19 = arith.constant 1.000000e+09 : f32
    %54 = vector.broadcast %cst_18 : f32 to vector<8x8xf32>
    %55 = arith.maximumf %54, %52 : vector<8x8xf32>
    %56 = vector.broadcast %cst_19 : f32 to vector<8x8xf32>
    %57 = arith.minimumf %56, %55 : vector<8x8xf32>
    %cst_20 = arith.constant 0.000000e+00 : f32
    %58 = vector.broadcast %cst_20 : f32 to vector<8x8xf32>
    %59 = arith.select %53, %58, %57 : vector<8x8xi1>, vector<8x8xf32>
    %cst_21 = arith.constant dense<0xFF800000> : vector<8xf32>
    %60 = vector.multi_reduction <maximumf>, %59, %cst_21 [1] : vector<8x8xf32> to vector<8xf32>
    %61 = vector.shape_cast %60 : vector<8xf32> to vector<8x1xf32>
    %62 = vector.broadcast %61 : vector<8x1xf32> to vector<8x8xf32>
    %63 = arith.subf %59, %62 : vector<8x8xf32>
    %64 = math.exp %63 : vector<8x8xf32>
    %cst_22 = arith.constant dense<0.000000e+00> : vector<8xf32>
    %65 = vector.multi_reduction <add>, %64, %cst_22 [1] : vector<8x8xf32> to vector<8xf32>
    %66 = vector.shape_cast %65 : vector<8xf32> to vector<8x1xf32>
    %67 = tpu.reciprocal %66 {approx = true} : vector<8x1xf32> -> vector<8x1xf32>
    %68 = vector.broadcast %67 : vector<8x1xf32> to vector<8x8xf32>
    %69 = arith.mulf %64, %68 : vector<8x8xf32>
    %cst_23 = arith.constant 9.99999971E-10 : f32
    %70 = vector.broadcast %cst_23 : f32 to vector<8x8xf32>
    %71 = arith.addf %69, %70 : vector<8x8xf32>
    %72 = arith.truncf %71 : vector<8x8xf32> to vector<8x8xbf16>
    %cst_24 = arith.constant dense<0.000000e+00> : vector<8x8xf32>
    %73 = tpu.matmul %72, %51, %cst_24 {dimension_numbers = #tpu.dot_dimension_numbers<[1], [0], [0], [1], [0, 0, 1, 1], [], []>} : vector<8x8xbf16>, vector<8x8xbf16>, vector<8x8xf32> -> vector<8x8xf32>
    %74 = arith.truncf %73 : vector<8x8xf32> to vector<8x8xbf16>
    %75 = vector.extract_strided_slice %19 {offsets = [0, 16], sizes = [8, 8], strides = [1, 1]} : vector<8x32xbf16> to vector<8x8xbf16>
    %76 = vector.extract_strided_slice %22 {offsets = [0, 16], sizes = [8, 8], strides = [1, 1]} : vector<8x64xbf16> to vector<8x8xbf16>
    %77 = vector.extract_strided_slice %22 {offsets = [0, 48], sizes = [8, 8], strides = [1, 1]} : vector<8x64xbf16> to vector<8x8xbf16>
    %cst_25 = arith.constant dense<0.000000e+00> : vector<8x8xf32>
    %78 = tpu.matmul %75, %76, %cst_25 {dimension_numbers = #tpu.dot_dimension_numbers<[1], [1], [0], [0], [0, 0, 1, 0], [], []>} : vector<8x8xbf16>, vector<8x8xbf16>, vector<8x8xf32> -> vector<8x8xf32>
    %79 = arith.cmpf one, %78, %78 : vector<8x8xf32>
    %cst_26 = arith.constant -1.000000e+09 : f32
    %cst_27 = arith.constant 1.000000e+09 : f32
    %80 = vector.broadcast %cst_26 : f32 to vector<8x8xf32>
    %81 = arith.maximumf %80, %78 : vector<8x8xf32>
    %82 = vector.broadcast %cst_27 : f32 to vector<8x8xf32>
    %83 = arith.minimumf %82, %81 : vector<8x8xf32>
    %cst_28 = arith.constant 0.000000e+00 : f32
    %84 = vector.broadcast %cst_28 : f32 to vector<8x8xf32>
    %85 = arith.select %79, %84, %83 : vector<8x8xi1>, vector<8x8xf32>
    %cst_29 = arith.constant dense<0xFF800000> : vector<8xf32>
    %86 = vector.multi_reduction <maximumf>, %85, %cst_29 [1] : vector<8x8xf32> to vector<8xf32>
    %87 = vector.shape_cast %86 : vector<8xf32> to vector<8x1xf32>
    %88 = vector.broadcast %87 : vector<8x1xf32> to vector<8x8xf32>
    %89 = arith.subf %85, %88 : vector<8x8xf32>
    %90 = math.exp %89 : vector<8x8xf32>
    %cst_30 = arith.constant dense<0.000000e+00> : vector<8xf32>
    %91 = vector.multi_reduction <add>, %90, %cst_30 [1] : vector<8x8xf32> to vector<8xf32>
    %92 = vector.shape_cast %91 : vector<8xf32> to vector<8x1xf32>
    %93 = tpu.reciprocal %92 {approx = true} : vector<8x1xf32> -> vector<8x1xf32>
    %94 = vector.broadcast %93 : vector<8x1xf32> to vector<8x8xf32>
    %95 = arith.mulf %90, %94 : vector<8x8xf32>
    %cst_31 = arith.constant 9.99999971E-10 : f32
    %96 = vector.broadcast %cst_31 : f32 to vector<8x8xf32>
    %97 = arith.addf %95, %96 : vector<8x8xf32>
    %98 = arith.truncf %97 : vector<8x8xf32> to vector<8x8xbf16>
    %cst_32 = arith.constant dense<0.000000e+00> : vector<8x8xf32>
    %99 = tpu.matmul %98, %77, %cst_32 {dimension_numbers = #tpu.dot_dimension_numbers<[1], [0], [0], [1], [0, 0, 1, 1], [], []>} : vector<8x8xbf16>, vector<8x8xbf16>, vector<8x8xf32> -> vector<8x8xf32>
    %100 = arith.truncf %99 : vector<8x8xf32> to vector<8x8xbf16>
    %101 = vector.extract_strided_slice %19 {offsets = [0, 24], sizes = [8, 8], strides = [1, 1]} : vector<8x32xbf16> to vector<8x8xbf16>
    %102 = vector.extract_strided_slice %22 {offsets = [0, 24], sizes = [8, 8], strides = [1, 1]} : vector<8x64xbf16> to vector<8x8xbf16>
    %103 = vector.extract_strided_slice %22 {offsets = [0, 56], sizes = [8, 8], strides = [1, 1]} : vector<8x64xbf16> to vector<8x8xbf16>
    %cst_33 = arith.constant dense<0.000000e+00> : vector<8x8xf32>
    %104 = tpu.matmul %101, %102, %cst_33 {dimension_numbers = #tpu.dot_dimension_numbers<[1], [1], [0], [0], [0, 0, 1, 0], [], []>} : vector<8x8xbf16>, vector<8x8xbf16>, vector<8x8xf32> -> vector<8x8xf32>
    %105 = arith.cmpf one, %104, %104 : vector<8x8xf32>
    %cst_34 = arith.constant -1.000000e+09 : f32
    %cst_35 = arith.constant 1.000000e+09 : f32
    %106 = vector.broadcast %cst_34 : f32 to vector<8x8xf32>
    %107 = arith.maximumf %106, %104 : vector<8x8xf32>
    %108 = vector.broadcast %cst_35 : f32 to vector<8x8xf32>
    %109 = arith.minimumf %108, %107 : vector<8x8xf32>
    %cst_36 = arith.constant 0.000000e+00 : f32
    %110 = vector.broadcast %cst_36 : f32 to vector<8x8xf32>
    %111 = arith.select %105, %110, %109 : vector<8x8xi1>, vector<8x8xf32>
    %cst_37 = arith.constant dense<0xFF800000> : vector<8xf32>
    %112 = vector.multi_reduction <maximumf>, %111, %cst_37 [1] : vector<8x8xf32> to vector<8xf32>
    %113 = vector.shape_cast %112 : vector<8xf32> to vector<8x1xf32>
    %114 = vector.broadcast %113 : vector<8x1xf32> to vector<8x8xf32>
    %115 = arith.subf %111, %114 : vector<8x8xf32>
    %116 = math.exp %115 : vector<8x8xf32>
    %cst_38 = arith.constant dense<0.000000e+00> : vector<8xf32>
    %117 = vector.multi_reduction <add>, %116, %cst_38 [1] : vector<8x8xf32> to vector<8xf32>
    %118 = vector.shape_cast %117 : vector<8xf32> to vector<8x1xf32>
    %119 = tpu.reciprocal %118 {approx = true} : vector<8x1xf32> -> vector<8x1xf32>
    %120 = vector.broadcast %119 : vector<8x1xf32> to vector<8x8xf32>
    %121 = arith.mulf %116, %120 : vector<8x8xf32>
    %cst_39 = arith.constant 9.99999971E-10 : f32
    %122 = vector.broadcast %cst_39 : f32 to vector<8x8xf32>
    %123 = arith.addf %121, %122 : vector<8x8xf32>
    %124 = arith.truncf %123 : vector<8x8xf32> to vector<8x8xbf16>
    %cst_40 = arith.constant dense<0.000000e+00> : vector<8x8xf32>
    %125 = tpu.matmul %124, %103, %cst_40 {dimension_numbers = #tpu.dot_dimension_numbers<[1], [0], [0], [1], [0, 0, 1, 1], [], []>} : vector<8x8xbf16>, vector<8x8xbf16>, vector<8x8xf32> -> vector<8x8xf32>
    %126 = arith.truncf %125 : vector<8x8xf32> to vector<8x8xbf16>
    %127 = tpu.concatenate %48, %74, %100, %126 in 1 : vector<8x8xbf16>, vector<8x8xbf16>, vector<8x8xbf16>, vector<8x8xbf16> -> vector<8x32xbf16>
    %128 = arith.index_cast %arg2 : i32 to index
    %c0_41 = arith.constant 0 : index
    %c0_42 = arith.constant 0 : index
    %129 = vector.load %arg8[%128, %c0_41, %c0_42] : memref<1x32x32xbf16, #tpu.memory_space<vmem>>, vector<1x32x32xbf16>
    %130 = vector.shape_cast %129 : vector<1x32x32xbf16> to vector<32x32xbf16>
    %cst_43 = arith.constant dense<0.000000e+00> : vector<8x32xf32>
    %131 = tpu.matmul %127, %130, %cst_43 {dimension_numbers = #tpu.dot_dimension_numbers<[1], [0], [0], [1], [0, 0, 1, 1], [], []>} : vector<8x32xbf16>, vector<32x32xbf16>, vector<8x32xf32> -> vector<8x32xf32>
    %c0_i32_44 = arith.constant 0 : i32
    %132 = arith.cmpi eq, %arg2, %c0_i32_44 : i32
    %133 = arith.extui %132 : i1 to i32
    %c0_i32_45 = arith.constant 0 : i32
    %134 = arith.cmpi ne, %133, %c0_i32_45 : i32
    scf.if %134 {
      %c0_50 = arith.constant 0 : index
      %c0_51 = arith.constant 0 : index
      %141 = vector.load %arg11[%c0_50, %c0_51] : memref<8x32xf32, #tpu.memory_space<vmem>>, vector<8x32xf32>
      tpu.vector_store %arg11[%c0_50, %c0_51], %131 {strides = array<i32>} : memref<8x32xf32, #tpu.memory_space<vmem>>, vector<8x32xf32>,
    } else {
    }
    %c0_i32_46 = arith.constant 0 : i32
    %135 = arith.cmpi sgt, %arg2, %c0_i32_46 : i32
    %136 = arith.extui %135 : i1 to i32
    %c0_i32_47 = arith.constant 0 : i32
    %137 = arith.cmpi ne, %136, %c0_i32_47 : i32
    scf.if %137 {
      %c0_50 = arith.constant 0 : index
      %c0_51 = arith.constant 0 : index
      %141 = vector.load %arg11[%c0_50, %c0_51] : memref<8x32xf32, #tpu.memory_space<vmem>>, vector<8x32xf32>
      %142 = arith.addf %141, %131 : vector<8x32xf32>
      %c0_52 = arith.constant 0 : index
      %c0_53 = arith.constant 0 : index
      %143 = vector.load %arg11[%c0_52, %c0_53] : memref<8x32xf32, #tpu.memory_space<vmem>>, vector<8x32xf32>
      tpu.vector_store %arg11[%c0_52, %c0_53], %142 {strides = array<i32>} : memref<8x32xf32, #tpu.memory_space<vmem>>, vector<8x32xf32>,
    } else {
    }
    %c0_i32_48 = arith.constant 0 : i32
    %138 = arith.cmpi eq, %arg2, %c0_i32_48 : i32
    %139 = arith.extui %138 : i1 to i32
    %c0_i32_49 = arith.constant 0 : i32
    %140 = arith.cmpi ne, %139, %c0_i32_49 : i32
    scf.if %140 {
      %c0_50 = arith.constant 0 : index
      %c0_51 = arith.constant 0 : index
      %141 = vector.load %arg11[%c0_50, %c0_51] : memref<8x32xf32, #tpu.memory_space<vmem>>, vector<8x32xf32>
      %c0_52 = arith.constant 0 : index
      %c0_53 = arith.constant 0 : index
      %142 = vector.load %arg9[%c0_52, %c0_53] : memref<1x32xf32, #tpu.memory_space<vmem>>, vector<1x32xf32>
      %143 = vector.broadcast %142 : vector<1x32xf32> to vector<8x32xf32>
      %144 = arith.addf %141, %143 : vector<8x32xf32>
      %c0_54 = arith.constant 0 : index
      %c0_55 = arith.constant 0 : index
      %c0_56 = arith.constant 0 : index
      %145 = vector.load %arg10[%c0_54, %c0_55, %c0_56] : memref<1x8x32xf32, #tpu.memory_space<vmem>>, vector<1x8x32xf32>
      %146 = vector.shape_cast %145 : vector<1x8x32xf32> to vector<8x32xf32>
      %147 = vector.shape_cast %144 : vector<8x32xf32> to vector<1x8x32xf32>
      tpu.vector_store %arg10[%c0_54, %c0_55, %c0_56], %147 {strides = array<i32>} : memref<1x8x32xf32, #tpu.memory_space<vmem>>, vector<1x8x32xf32>,
    } else {
    }
    return
  }
  func.func @transform_0(%arg0: i32, %arg1: i32, %arg2: i32) -> (i32, i32, i32) {
    %c0_i32 = arith.constant 0 : i32
    %c0_i32_0 = arith.constant 0 : i32
    %c0_i32_1 = arith.constant 0 : i32
    return %arg0, %c0_i32, %c0_i32_0 : i32, i32, i32
  }
  func.func @transform_1(%arg0: i32, %arg1: i32, %arg2: i32) -> (i32, i32, i32) {
    %c0_i32 = arith.constant 0 : i32
    %c0_i32_0 = arith.constant 0 : i32
    %c0_i32_1 = arith.constant 0 : i32
    %c0_i32_2 = arith.constant 0 : i32
    return %c0_i32, %c0_i32_0, %c0_i32_1 : i32, i32, i32
  }
  func.func @transform_2(%arg0: i32, %arg1: i32, %arg2: i32) -> (i32, i32, i32) {
    %c0_i32 = arith.constant 0 : i32
    %c0_i32_0 = arith.constant 0 : i32
    %c0_i32_1 = arith.constant 0 : i32
    %c0_i32_2 = arith.constant 0 : i32
    return %c0_i32, %c0_i32_0, %c0_i32_1 : i32, i32, i32
  }
  func.func @transform_3(%arg0: i32, %arg1: i32, %arg2: i32) -> (i32, i32, i32) {
    %c0_i32 = arith.constant 0 : i32
    %c0_i32_0 = arith.constant 0 : i32
    %c0_i32_1 = arith.constant 0 : i32
    %c0_i32_2 = arith.constant 0 : i32
    return %c0_i32, %c0_i32_0, %c0_i32_1 : i32, i32, i32
  }
  func.func @transform_4(%arg0: i32, %arg1: i32, %arg2: i32) -> (i32, i32, i32) {
    %c0_i32 = arith.constant 0 : i32
    %c0_i32_0 = arith.constant 0 : i32
    %c0_i32_1 = arith.constant 0 : i32
    %c0_i32_2 = arith.constant 0 : i32
    return %c0_i32, %c0_i32_0, %c0_i32_1 : i32, i32, i32
  }
  func.func @transform_5(%arg0: i32, %arg1: i32, %arg2: i32) -> (i32, i32, i32) {
    %c0_i32 = arith.constant 0 : i32
    %c0_i32_0 = arith.constant 0 : i32
    %c0_i32_1 = arith.constant 0 : i32
    %c0_i32_2 = arith.constant 0 : i32
    return %c0_i32, %c0_i32_0, %c0_i32_1 : i32, i32, i32
  }
  func.func @transform_6(%arg0: i32, %arg1: i32, %arg2: i32) -> (i32, i32) {
    %c0_i32 = arith.constant 0 : i32
    %c0_i32_0 = arith.constant 0 : i32
    %c0_i32_1 = arith.constant 0 : i32
    return %c0_i32, %c0_i32_0 : i32, i32
  }
  func.func @transform_7(%arg0: i32, %arg1: i32, %arg2: i32) -> (i32, i32, i32) {
    %c0_i32 = arith.constant 0 : i32
    %c0_i32_0 = arith.constant 0 : i32
    return %arg0, %arg1, %c0_i32 : i32, i32, i32
  }
}

</mosaic_0001>

<bundles_post_ra>
// kernel: tpu_custom_call.1
= control target key start
LH: loop header
LB: loop body
LE: loop exit
PB: predicated region body
PF: predicated region fallthrough
CT: control target
= control target key end

     0   :  { %s2381_s0 = inlined_call_operand.hbm [shape: bf16[2,8,32], index: 0, kind: input, shape index: {}]   ;;  %s2382_s1 = inlined_call_operand.hbm [shape: bf16[1,32,32], index: 1, kind: input, shape index: {}]   ;;  %s2383_s2 = inlined_call_operand.hbm [shape: bf16[1,32,64], index: 2, kind: input, shape index: {}]   ;;  %s2384_s3 = inlined_call_operand.hbm [shape: f32[1,1,32], index: 3, kind: input, shape index: {}]   ;;  %s2385_s4 = inlined_call_operand.hbm [shape: f32[1,1,64], index: 4, kind: input, shape index: {}]   ;;  %s2386_s5 = inlined_call_operand.hbm [shape: bf16[1,32,32], index: 5, kind: input, shape index: {}]   ;;  %s2387_s6 = inlined_call_operand.hbm [shape: f32[1,32], index: 6, kind: input, shape index: {}]   ;;  %s2388_s7 = inlined_call_operand.hbm [shape: f32[2,8,32], index: 7, kind: output, shape index: {}]  }
   0x1   :  { %2395 = sst [smem:[#allocation22_spill]] %s2382_s1 }
   0x2   :  { %2396 = sst [smem:[#allocation23_spill]] %s2388_s7 }
   0x3   :  { %12 = vsyncpa [#allocation5], 0 }
   0x4   :  { %14 = vsyncpa [#allocation5 + $0x1], 0 }
   0x5   :  { %15 = vsyncpa [#allocation8], 0 }
   0x6   :  { %16 = vsyncpa [#allocation11], 0 }
   0x7   :  { %17 = vsyncpa [#allocation14], 0 }
   0x8   :  { %18 = vsyncpa [#allocation6], 0 }
   0x9   :  { %20 = vsyncpa [#allocation6 + $0x1], 0  ;;  %s1960_s24 = smov 0   ;;  %s1962_s25 = smov 0  }
   0xa   :  { %s1964_s26 = smov 0   ;;  %s1966_s27 = smov 0  }
   0xb   :  { %s1968_s28 = smov 0   ;;  %s1970_s29 = smov 0  }
   0xc LB: > { %s2389_s30 = sadd.s32 4294967295, %s1896_s29   ;;  %p1299_p0 = scmp.ge.s32.totalorder %s1896_s29, 1  ;;  %s1896_s29 = sphi %s1970_s29, %s26_s29   ;;  %s1892_s28 = sphi %s1968_s28, %s2419_s28   ;;  %s1888_s27 = sphi %s1966_s27, %s2418_s27   ;;  %s1884_s26 = sphi %s1964_s26, %s2417_s26   ;;  %s1880_s25 = sphi %s1962_s25, %s2416_s25   ;;  %s1876_s24 = sphi %s1960_s24, %s2415_s24  }
   0xd   : > { %p1994_p1 = scmp.eq.s32.totalorder %s2389_s30, 0  ;;  %p230_p2 = scmp.lt.s32.totalorder %s1896_s29, 3 }
   0xe   : > { %s1898_s10 = smov [#allocation7]   ;;  %s1899_s13 = smov [#allocation10]  }
   0xf   : > { %s2397_s8 = scalar_select %p1994_p1, 1, 0 }
  0x10   : > { %p1999_p3 = pnand %p1299_p0, %p230_p2  ;;  %s242_s11 = sshll.u32 %s1898_s10, 4  ;;  %s2003_s11 = int_to_ptr.vmem [resolvable:$true] %s242_s11 }
  0x11   : > { %s269_s14 = sshll.u32 %s1899_s13, 4  ;;  %s1900_s15 = smov [#allocation13]   ;;  %s2014_s14 = int_to_ptr.vmem [resolvable:$true] %s269_s14 }
  0x12   : > { %s2398_s9 = scalar_select %p1999_p3, 1, 0 }
  0x13   : > { %p1472_p4 = pneg %p1999_p3  ;;  %s2016_s16 = sshll.u32 %s1900_s15, 4  ;;  %s291_s16 = int_to_ptr.vmem [resolvable:$true] %s2016_s16 }
  0x14   : > { %s2400_s1 = sld [smem:[#allocation22_spill]] }
  0x15   : > { %p2010_p6 = pnand %p1472_p4, %p1994_p1 }
  0x17   : > { %p2026_p8 = pneg %p2010_p6 }
  0x1a   : > { %s1604_s19 = scalar_lea.hbm %s2400_s1, 256 }
  0x1b   : > { %p1605_p7 = scmp.ne.s32.totalorder %s2400_s1, %s1604_s19  ;;  %p1611_p11 = scmp.lt.u32.totalorder %s1604_s19, %s2400_s1 }
  0x1d   : > { %p1607_p9 = pnand %p2026_p8, %p1605_p7 }
  0x1f   : > { %p1608_p10 = pneg %p1607_p9 }
  0x21   : > { %p1613_p12 = pnand %p1611_p11, %p1608_p10 }
  0x23   : > { %1616 = shalt.err (!%p1613_p12)
}
  0x24   : > { %s1617_s13 = scalar_lea.vmem %s2003_s11, 256  ;;  %p1625_p4 = scmp.lt.s32.totalorder %s2003_s11, %s2003_s11 }
  0x25   : > { %p1618_p13 = scmp.ne.s32.totalorder %s2003_s11, %s1617_s13  ;;  %p1626_p5 = scmp.lt.s32.totalorder %s1617_s13, %s1617_s13 }
  0x27   : > { %p1620_p0 = pnand %p1618_p13, %p2026_p8  ;;  %p1627_p7 = por %p1626_p5, %p1625_p4 }
  0x29   : > { %p1621_p2 = pneg %p1620_p0 }
  0x2b   : > { %p1628_p9 = pnand %p1627_p7, %p1621_p2 }
  0x2d   : > { %1631 = shalt.err (!%p1628_p9)
}
  0x2e   : > { %s1901_s15 = smov 64   ;;  %s1902_s17 = smov 4  }
  0x2f   : > { %1475 = dma.hbm_to_vmem [thread:$0]  (!%p2010_p6), %s2400_s1, 256, %s2003_s11, [#allocation8], %s1901_s15, %s1901_s15, %s1902_s17  }
  0x30   : > { %s1632_s23 = scalar_lea.hbm %s2384_s3, 16 }
  0x31   : > { %p1633_p5 = scmp.ne.s32.totalorder %s2384_s3, %s1632_s23  ;;  %p1639_p12 = scmp.lt.u32.totalorder %s1632_s23, %s2384_s3 }
  0x33   : > { %p1635_p10 = pnand %p1633_p5, %p2026_p8 }
  0x35   : > { %p1636_p11 = pneg %p1635_p10 }
  0x37   : > { %p1641_p13 = pnand %p1639_p12, %p1636_p11 }
  0x39   : > { %1644 = shalt.err (!%p1641_p13)
}
  0x3a   : > { %s1645_s11 = scalar_lea.vmem %s2014_s14, 16  ;;  %s1652_s18 = scalar_lea.vmem %s2014_s14, 32 }
  0x3b   : > { %p1646_p0 = scmp.ne.s32.totalorder %s2014_s14, %s1645_s11  ;;  %p1653_p7 = scmp.lt.s32.totalorder %s2014_s14, %s2014_s14 }
  0x3c   : > { %p1654_p9 = scmp.lt.s32.totalorder %s1652_s18, %s1645_s11 }
  0x3d   : > { %p1648_p2 = pnand %p1646_p0, %p2026_p8 }
  0x3e   : > { %p1655_p5 = por %p1654_p9, %p1653_p7 }
  0x3f   : > { %p1649_p4 = pneg %p1648_p2 }
  0x41   : > { %p1656_p10 = pnand %p1655_p5, %p1649_p4 }
  0x43   : > { %1659 = shalt.err (!%p1656_p10)
}
  0x44   : > { %1481 = dma.hbm_to_vmem [thread:$0]  (!%p2010_p6), %s2384_s3, 16, %s2014_s14, [#allocation11]  }
  0x45   : > { %s1660_s21 = scalar_lea.hbm %s2386_s5, 256 }
  0x46   : > { %p1661_p11 = scmp.ne.s32.totalorder %s2386_s5, %s1660_s21  ;;  %p1667_p0 = scmp.lt.u32.totalorder %s1660_s21, %s2386_s5 }
  0x48   : > { %p1663_p12 = pnand %p1661_p11, %p2026_p8 }
  0x4a   : > { %p1664_p13 = pneg %p1663_p12 }
  0x4c   : > { %p1669_p2 = pnand %p1667_p0, %p1664_p13 }
  0x4e   : > { %1672 = shalt.err (!%p1669_p2)
}
  0x4f   : > { %s1673_s18 = scalar_lea.vmem %s291_s16, 256  ;;  %p1681_p5 = scmp.lt.s32.totalorder %s291_s16, %s291_s16 }
  0x50   : > { %p1674_p4 = scmp.ne.s32.totalorder %s291_s16, %s1673_s18  ;;  %p1682_p10 = scmp.lt.s32.totalorder %s1673_s18, %s1673_s18 }
  0x52   : > { %p1676_p7 = pnand %p1674_p4, %p2026_p8  ;;  %p1683_p3 = por %p1682_p10, %p1681_p5 }
  0x54   : > { %p1677_p9 = pneg %p1676_p7 }
  0x56   : > { %p1684_p1 = pnand %p1683_p3, %p1677_p9 }
  0x58   : > { %1687 = shalt.err (!%p1684_p1)
}
  0x59   : > { %1487 = dma.hbm_to_vmem [thread:$0]  (!%p2010_p6), %s2386_s5, 256, %s291_s16, [#allocation14], %s1901_s15, %s1901_s15, %s1902_s17  }
  0x5a   : > { %s1903_s30 = smov [#allocation9]   ;;  %s1904_s20 = smov [#allocation12]  }
  0x5b   : > { %s255_s19 = sshll.u32 %s1903_s30, 4  ;;  %s280_s21 = sshll.u32 %s1904_s20, 4  ;;  %s256_s19 = int_to_ptr.vmem [resolvable:$true] %s255_s19  ;;  %s281_s21 = int_to_ptr.vmem [resolvable:$true] %s280_s21 }
  0x5c   : > { %s1688_s13 = scalar_lea.hbm %s2383_s2, 256 }
  0x5d   : > { %p1689_p1 = scmp.ne.s32.totalorder %s2383_s2, %s1688_s13  ;;  %p1695_p12 = scmp.lt.u32.totalorder %s1688_s13, %s2383_s2 }
  0x5f   : > { %p1691_p3 = pnand %p1689_p1, %p2026_p8 }
  0x61   : > { %p1692_p11 = pneg %p1691_p3 }
  0x63   : > { %p1697_p13 = pnand %p1695_p12, %p1692_p11 }
  0x65   : > { %1700 = shalt.err (!%p1697_p13)
}
  0x66   : > { %s1701_s16 = scalar_lea.vmem %s256_s19, 256  ;;  %p1709_p7 = scmp.lt.s32.totalorder %s256_s19, %s256_s19 }
  0x67   : > { %p1702_p0 = scmp.ne.s32.totalorder %s256_s19, %s1701_s16  ;;  %p1710_p9 = scmp.lt.s32.totalorder %s1701_s16, %s1701_s16 }
  0x69   : > { %p1704_p2 = pnand %p1702_p0, %p2026_p8  ;;  %p1711_p5 = por %p1710_p9, %p1709_p7 }
  0x6b   : > { %p1705_p4 = pneg %p1704_p2 }
  0x6d   : > { %p1712_p10 = pnand %p1711_p5, %p1705_p4 }
  0x6f   : > { %1715 = shalt.err (!%p1712_p10)
}
  0x70   : > { %1478 = dma.hbm_to_vmem [thread:$0]  (!%p2010_p6), %s2383_s2, 256, %s256_s19, [#allocation8], %s1901_s15, %s1901_s15, %s1902_s17  }
  0x71   : > { %s1716_s23 = scalar_lea.hbm %s2385_s4, 16 }
  0x72   : > { %p1717_p1 = scmp.ne.s32.totalorder %s2385_s4, %s1716_s23  ;;  %p1723_p12 = scmp.lt.u32.totalorder %s1716_s23, %s2385_s4 }
  0x74   : > { %p1719_p3 = pnand %p1717_p1, %p2026_p8 }
  0x76   : > { %p1720_p11 = pneg %p1719_p3 }
  0x78   : > { %p1725_p13 = pnand %p1723_p12, %p1720_p11 }
  0x7a   : > { %1728 = shalt.err (!%p1725_p13)
}
  0x7b   : > { %s1729_s14 = scalar_lea.vmem %s281_s21, 16  ;;  %s1736_s15 = scalar_lea.vmem %s281_s21, 32 }
  0x7c   : > { %p1730_p0 = scmp.ne.s32.totalorder %s281_s21, %s1729_s14  ;;  %p1737_p7 = scmp.lt.s32.totalorder %s281_s21, %s281_s21 }
  0x7d   : > { %p1738_p9 = scmp.lt.s32.totalorder %s1736_s15, %s1729_s14 }
  0x7e   : > { %p1732_p2 = pnand %p1730_p0, %p2026_p8 }
  0x7f   : > { %p1739_p5 = por %p1738_p9, %p1737_p7 }
  0x80   : > { %p1733_p4 = pneg %p1732_p2 }
  0x82   : > { %p1740_p10 = pnand %p1739_p5, %p1733_p4 }
  0x84   : > { %1743 = shalt.err (!%p1740_p10)
}
  0x85   : > { %1484 = dma.hbm_to_vmem [thread:$0]  (!%p2010_p6), %s2385_s4, 16, %s281_s21, [#allocation11]  }
  0x86   : > { %s1905_s16 = smov [#allocation15]   ;;  %s1744_s20 = scalar_lea.hbm %s2387_s6, 16 }
  0x87   : > { %s304_s1 = sshll.u32 %s1905_s16, 4  ;;  %p1745_p1 = scmp.ne.s32.totalorder %s2387_s6, %s1744_s20  ;;  %s305_s1 = int_to_ptr.vmem [resolvable:$true] %s304_s1 }
  0x88   : > { %p1751_p12 = scmp.lt.u32.totalorder %s1744_s20, %s2387_s6 }
  0x89   : > { %p1747_p3 = pnand %p1745_p1, %p2026_p8 }
  0x8b   : > { %p1748_p11 = pneg %p1747_p3 }
  0x8d   : > { %p1753_p13 = pnand %p1751_p12, %p1748_p11 }
  0x8f   : > { %1756 = shalt.err (!%p1753_p13)
}
  0x90   : > { %s1757_s21 = scalar_lea.vmem %s305_s1, 16  ;;  %s1764_s18 = scalar_lea.vmem %s305_s1, 32 }
  0x91   : > { %p1758_p0 = scmp.ne.s32.totalorder %s305_s1, %s1757_s21  ;;  %p1765_p7 = scmp.lt.s32.totalorder %s305_s1, %s305_s1 }
  0x92   : > { %p1766_p9 = scmp.lt.s32.totalorder %s1764_s18, %s1757_s21 }
  0x93   : > { %p1760_p2 = pnand %p1758_p0, %p2026_p8 }
  0x94   : > { %p1767_p5 = por %p1766_p9, %p1765_p7 }
  0x95   : > { %p1761_p4 = pneg %p1760_p2 }
  0x97   : > { %p1768_p10 = pnand %p1767_p5, %p1761_p4 }
  0x99   : > { %1771 = shalt.err (!%p1768_p10)
}
  0x9a   : > { %1490 = dma.hbm_to_vmem [thread:$0]  (!%p2010_p6), %s2387_s6, 16, %s305_s1, [#allocation14]  }
  0x9b   : > { %s1298_s22 = sadd.s32 4294967294, %s1896_s29   ;;  %s45_s17 = sadd.s32 1, %s1892_s28 }
  0x9c   : > { %p47_p8 = scmp.ge.s32.totalorder %s45_s17, 2  ;;  %s52_s12 = sadd.s32 1, %s1884_s26 }
  0x9d   : > { %p59_p1 = scmp.ne.s32.totalorder %s1884_s26, %s1880_s25  ;;  %p60_p3 = scmp.eq.s32.totalorder %s1896_s29, 0 }
  0x9e   : > { %s2421_s17 = smov (%p47_p8, %s45_s17), 0  ;;  %p65_p12 = scmp.ne.s32.totalorder %s1880_s25, %s1876_s24 }
  0x9f   : > { %p2161_p11 = por %p60_p3, %p59_p1  ;;  %s49_s16 = ssub.s32 %s1892_s28, %s2421_s17 }
  0xa0   : > { %s2403_s1 = sadd.s32 4294967295, %s1896_s29   ;;  %p50_p13 = scmp.eq.s32.totalorder %s49_s16, 0 }
  0xa1   : > { %p217_p6 = scmp.eq.s32.totalorder %s2403_s1, 1  ;;  %p2404_p0 = scmp.ne.s32.totalorder %s2397_s8, 0 }
  0xa2   : > { %p223_p7 = scmp.eq.s32.totalorder %s1298_s22, 1  ;;  %p1505_p5 = scmp.lt.s32.totalorder %s1896_s29, 2 }
  0xa3   : > { %p2173_p2 = por %p2404_p0, %p65_p12  ;;  %p2177_p4 = por %p217_p6, %p59_p1 }
  0xa4   : > { %s2182_s20 = scalar_select %p50_p13, %s1884_s26, %s52_s12  }
  0xa5   : > { %s2406_s30 = scalar_select %p2177_p4, 1, 0 }
  0xa6   : > { %p2184_p9 = por %p223_p7, %p65_p12  ;;  %s315_s10 = sand.u32 1, %s1884_s26  }
  0xa7   : > { %s1308_s13 = sshll.u32 %s1892_s28, 6  ;;  %s1307_s11 = sshll.u32 %s315_s10, 2 }
  0xa8   : > { %s2407_s23 = scalar_select %p2184_p9, 1, 0 }
  0xa9   : > { %s2194_s14 = scalar_lea.hbm %s2381_s0, %s1308_s13  ;;  %s319_s15 = scalar_lea.vmem [#allocation4], %s1307_s11 }
  0xaa   : > { %s326_s22 = sshll.u32 %s319_s15, 4  ;;  %p2198_p10 = pnand %p1505_p5, %p2161_p11  ;;  %s2202_s22 = int_to_ptr.vmem [resolvable:$true] %s326_s22 }
  0xab   : > { %s316_s16 = scalar_lea.sflag [#allocation5], %s315_s10  ;;  %s1772_s1 = scalar_lea.hbm %s2194_s14, 64 }
  0xac   : > { %p1773_p8 = scmp.ne.s32.totalorder %s2194_s14, %s1772_s1  ;;  %p1774_p1 = pneg %p2198_p10 }
  0xad   : > { %s1777_s19 = scalar_lea.hbm %s2381_s0, 128  ;;  %p1778_p11 = scmp.lt.u32.totalorder %s2194_s14, %s2381_s0 }
  0xae   : > { %p1775_p3 = pnand %p1774_p1, %p1773_p8  ;;  %p1779_p6 = scmp.lt.u32.totalorder %s1777_s19, %s1772_s1 }
  0xaf   : > { %p1781_p0 = scmp.lt.u32.totalorder %s1772_s1, %s2194_s14 }
  0xb0   : > { %p1776_p12 = pneg %p1775_p3  ;;  %p1780_p13 = por %p1779_p6, %p1778_p11 }
  0xb2   : > { %p1782_p7 = por %p1781_p0, %p1780_p13 }
  0xb4   : > { %p1783_p5 = pnand %p1782_p7, %p1776_p12 }
  0xb6   : > { %1786 = shalt.err (!%p1783_p5)
}
  0xb7   : > { %s1787_s10 = scalar_lea.vmem %s2202_s22, 64  ;;  %s1906_s15 = smov [#allocation4]  }
  0xb8   : > { %p1788_p8 = scmp.ne.s32.totalorder %s2202_s22, %s1787_s10  ;;  %s1792_s13 = sshll.u32 %s1906_s15, 4  ;;  %s1793_s13 = int_to_ptr.vmem [resolvable:$false] %s1792_s13 }
  0xb9   : > { %s1794_s11 = scalar_lea.vmem %s1793_s13, 128  ;;  %p1795_p4 = scmp.lt.s32.totalorder %s2202_s22, %s1793_s13 }
  0xba   : > { %p1790_p3 = pnand %p1788_p8, %p1774_p1  ;;  %p1796_p11 = scmp.lt.s32.totalorder %s1794_s11, %s1787_s10 }
  0xbc   : > { %p1791_p9 = pneg %p1790_p3  ;;  %p1797_p6 = por %p1796_p11, %p1795_p4 }
  0xbe   : > { %p1798_p13 = pnand %p1797_p6, %p1791_p9 }
  0xc0   : > { %1801 = shalt.err (!%p1798_p13)
}
  0xc1   : > { %1494 = dma.hbm_to_vmem [thread:$0]  (!%p2198_p10), %s2194_s14, 64, %s2202_s22, %s316_s16  }
  0xc2   : > { %p2409_p12 = scmp.ne.s32.totalorder %s2398_s9, 0 }
  0xc3   : > { %s2232_s1 = sand.u32 (!%p2409_p12), 1, %s1880_s25  }
  0xc4   : > { %335 = sbr.rel (%p2409_p12) target bundleno = 1692 (0x69c), region = 48  ;;  %s1310_s19 = sshll.u32 (!%p2409_p12), %s2232_s1, 2 }
  0xc5   : > { %s338_s21 = scalar_lea.sflag (!%p2409_p12), [#allocation5], %s2232_s1  ;;  %s341_s18 = scalar_lea.vmem (!%p2409_p12), [#allocation4], %s1310_s19 }
  0xcb   : > { %1855 = dma.done.wait (%p2173_p2), %s338_s21, 64  }
  0xcc   : > { %1857 = vsyncadd (%p2173_p2), %s338_s21, 4294967232  ;;  %p2410_p4 = scmp.ne.s32.totalorder %s2397_s8, 0 }
  0xce   : > { %1859 = dma.done.wait (%p2410_p4), [#allocation8], 512  }
  0xcf   : > { %1861 = vsyncadd (%p2410_p4), [#allocation8], 4294966784 }
  0xd0   : > { %1863 = dma.done.wait (%p2410_p4), [#allocation11], 32  }
  0xd1   : > { %1865 = vsyncadd (%p2410_p4), [#allocation11], 4294967264 }
  0xd2   : > { %1867 = dma.done.wait (%p2410_p4), [#allocation14], 272  }
  0xd3   : > { %1869 = vsyncadd (%p2410_p4), [#allocation14], 4294967024  ;;  %v1907_v0 = vmov 0.0   ;;  %vm1908_vm0 = vmmov 0   ;;  %v1581_v1 = vld [vmem:[#allocation9] sm:$0xff]   ;;  %v1582_v2 = vld [vmem:[#allocation9 + $0x8] sm:$0xff]  }
  0xd4   : > { %1372 = vmatprep.subr.bf16.mxu0 %v1907_v0  ;;  %1376 = vmatprep.mubr.msk.bf16.mxu0 %vm1908_vm0, %v1907_v0  ;;  %v1583_v3 = vld [vmem:[#allocation7] sm:$0xff]   ;;  %v1584_v4 = vld [vmem:[#allocation7 + $0x8] sm:$0xff]   ;;  %v401_v5 = vld [vmem:[%s341_s18] sm:$0xf]  ;;  %vm429_vm1 = vcmask 261120   ;;  %vm476_vm2 = vcmask 519168  }
  0xd5   : > { %1380 = vmatprep.subr.bf16.mxu1 %v1907_v0  ;;  %1384 = vmatprep.mubr.msk.bf16.mxu1 %vm1908_vm0, %v1907_v0  ;;  %v483_v6 = vld [vmem:[%s341_s18] sm:$0xf]  ;;  %v1318_v7 = vld [vmem:[#allocation12] ss:$0 sm:$0xff]  ;;  %v1322_v15 = vld [vmem:[#allocation10] ss:$0 sm:$0xff] }
  0xd6   : > { %1373 = vmatpush3.bf16.msra.mxu0 %v1581_v1  ;;  %1381 = vmatpush3.bf16.msra.mxu1 %v1583_v3  ;;  %vm560_vm3 = vcmask 64512   ;;  %s1909_s8 = smov 112   ;;  %s1910_s9 = smov 120   ;;  %vm632_vm8 = vcmask 1043456   ;;  %vm1038_vm9 = vcmask 130048   ;;  %vm1041_vm10 = vcmask 195584  }
  0xd7   : > { %1374 = vmatprep.subr.bf16.mxu0 %v1907_v0  ;;  %1382 = vmatprep.subr.bf16.mxu1 %v1907_v0  ;;  %s1911_s7 = smov 104   ;;  %s1912_s14 = smov 96  }
  0xd8   : > { %s1913_s22 = smov 80   ;;  %s1914_s12 = smov 72  }
  0xd9   : > { %s1915_s16 = smov 88   ;;  %s1916_s10 = smov 8  }
  0xda   : > { %1375 = vmatpush3.bf16.msra.mxu0 %v1582_v2  ;;  %1383 = vmatpush3.bf16.msra.mxu1 %v1584_v4  ;;  %s1917_s15 = smov 16   ;;  %s1918_s13 = smov 24  }
  0xdb   : > { %1388 = vmatprep.subr.bf16.mxu0 %v1907_v0  ;;  %1394 = vmatprep.subr.bf16.mxu1 %v1907_v0  ;;  %s1317_s11 = sshll.u32 %s2232_s1, 3  ;;  %s1344_s19 = sshll.u32 %s1888_s27, 7 }
  0xdc   : > { %s395_s21 = scalar_lea.vmem [#allocation16], %s1317_s11  ;;  %p2412_p9 = scmp.ne.s32.totalorder %s2406_s30, 0 }
  0xdd   : > { %1377 = vmatmul.mubr.msk.bf16.vlgmr.msra.gmra.mrb[0].mxu0 %vm429_vm1, %v401_v5  ;;  %1385 = vmatmul.mubr.msk.bf16.vlgmr.msra.gmra.mrb[0].mxu1 %vm429_vm1, %v483_v6  ;;  %s1144_s18 = sshll.u32 %s395_s21, 4  ;;  %s1919_s27 = smov [#allocation16]   ;;  %s2333_s18 = int_to_ptr.vmem [resolvable:$true] %s1144_s18 }
  0xde   : > { %1390 = vmatprep.mubr.msk.bf16.mxu0 %vm1908_vm0, %v1907_v0  ;;  %1396 = vmatprep.mubr.msk.bf16.mxu1 %vm1908_vm0, %v1907_v0 }
 0x1b0   : > { %v467_v8 = vpop.f32.mrb[0].mxu0  ;;  %v549_v14 = vpop.f32.mrb[0].mxu1 }
 0x1b1   : > { %v468_v9 = vadd.f32 %v1318_v7, %v467_v8  ;;  %v1378_v10 = vpop.f32.mrb[1].mxu0  ;;  %v1386_v16 = vpop.f32.mrb[1].mxu1  ;;  %v550_v19 = vadd.f32 %v1322_v15, %v549_v14 }
 0x1b2   : > { %v470_v11 = vpop.f32.mrb[2].mxu0  ;;  %v552_v17 = vpop.f32.mrb[2].mxu1 }
 0x1b3   : > { %v473_v12 = vpack.c.bf16 %v468_v9, %v468_v9  ;;  %v1379_v13 = vpop.f32.mrb[3].mxu0  ;;  %v1387_v18 = vpop.f32.mrb[3].mxu1  ;;  %v555_v20 = vmul.f32 0.35355338, %v550_v19 }
 0x1b5   : > { %477 = vst.msk [vmem:[#allocation3] sm:$0xf] %vm476_vm2, %v473_v12  ;;  %v556_v24 = vpack.c.bf16 %v555_v20, %v555_v20 }
 0x1bc   : > { %v559_v21 = vld [vmem:[#allocation3] sm:$0xf] }
 0x1bd   : > { %v565_v22 = vsel %vm560_vm3, %v559_v21, 0  ;;  %v2269_v23 = vcombine.low %v559_v21, %v559_v21 }
 0x1be   : > { %1389 = vmatpush3.bf16.xpose.msra.mxu0 %v565_v22 }
 0x1bf   : > { %796 = vrot.lane.b32.xlu1 %v2269_v23, %s1909_s8  ;;  %680 = vrot.lane.b32.xlu0 %v2269_v23, %s1910_s9 }
 0x1c0   : > { %1400 = vmatprep.subr.bf16.mxu0 %v1907_v0 }
 0x1c3   : > { %794 = vrot.lane.b32.xlu1 %v556_v24, %s1909_s8  ;;  %678 = vrot.lane.b32.xlu0 %v556_v24, %s1910_s9 }
 0x1c5   : > { %1391 = vmatmul.mubr.msk.bf16.vlgmr.msra.gmra.mrb[4].mxu0 %vm560_vm3, %v556_v24 }
 0x1c6   : > { %1402 = vmatprep.mubr.msk.bf16.mxu0 %vm1908_vm0, %v1907_v0 }
 0x1c7   : > { %910 = vrot.lane.b32.xlu1 %v556_v24, %s1911_s7  ;;  %912 = vrot.lane.b32.xlu0 %v2269_v23, %s1911_s7  ;;  %s2411_s7 = sld [smem:[#allocation23_spill]] }
 0x231   : > { %v681_v25 = vpop.permute.xlu0 %680  ;;  %v797_v27 = vpop.permute.xlu1 %796 }
 0x232   : > { %v686_v26 = vsel %vm560_vm3, %v681_v25, 0  ;;  %v802_v29 = vsel %vm560_vm3, %v797_v27, 0 }
 0x233   : > { %1401 = vmatpush3.bf16.xpose.msra.mxu0 %v686_v26 }
 0x234   : > { %1412 = vmatprep.subr.bf16.mxu0 %v1907_v0 }
 0x235   : > { %v679_v28 = vpop.permute.xlu0 %678  ;;  %v795_v31 = vpop.permute.xlu1 %794 }
 0x239   : > { %v913_v30 = vpop.permute.xlu0 %912  ;;  %v911_v33 = vpop.permute.xlu1 %910 }
 0x23a   : > { %1403 = vmatmul.mubr.msk.bf16.vlgmr.msra.gmra.mrb[8].mxu0 %vm560_vm3, %v679_v28  ;;  %v918_v32 = vsel %vm560_vm3, %v913_v30, 0 }
 0x23b   : > { %1413 = vmatpush3.bf16.xpose.msra.mxu0 %v802_v29  ;;  %1414 = vmatprep.mubr.msk.bf16.mxu0 %vm1908_vm0, %v1907_v0 }
 0x23c   : > { %1424 = vmatprep.subr.bf16.mxu0 %v1907_v0 }
 0x242   : > { %1415 = vmatmul.mubr.msk.bf16.vlgmr.msra.gmra.mrb[12].mxu0 %vm560_vm3, %v795_v31 }
 0x243   : > { %1425 = vmatpush3.bf16.xpose.msra.mxu0 %v918_v32  ;;  %1426 = vmatprep.mubr.msk.bf16.mxu0 %vm1908_vm0, %v1907_v0 }
 0x244   : > { %1436 = vmatprep.subr.bf16.mxu0 %v1907_v0 }
 0x24a   : > { %1427 = vmatmul.mubr.msk.bf16.vlgmr.msra.gmra.mrb[16].mxu0 %vm560_vm3, %v911_v33 }
 0x24b   : > { %1440 = vmatprep.mubr.msk.bf16.mxu0 %vm1908_vm0, %v1907_v0 }
 0x298   : > { %v601_v34 = vpop.f32.mrb[4].mxu0 }
 0x299   : > { %vm607_vm4 = vcmp.ne.f32.partialorder %v601_v34, %v601_v34  ;;  %v1327_v35 = vclamps-f32 %v601_v34, 1e+09  ;;  %v1392_v36 = vpop.f32.mrb[5].mxu0 }
 0x29a   : > { %v604_v37 = vpop.f32.mrb[6].mxu0 }
 0x29b   : > { %v1393_v38 = vpop.f32.mrb[7].mxu0  ;;  %v610_v39 = vsel %vm607_vm4, 0.0, %v1327_v35 }
 0x29c   : > { %v611_v40 = vsel %vm560_vm3, %v610_v39, -inf }
 0x29d   : > { %612 = vmax.xlane.f32.xlu0 %v611_v40 }
 0x30d   : > { %v722_v41 = vpop.f32.mrb[8].mxu0 }
 0x30e   : > { %vm728_vm5 = vcmp.ne.f32.partialorder %v722_v41, %v722_v41  ;;  %v1331_v42 = vclamps-f32 %v722_v41, 1e+09  ;;  %v1404_v43 = vpop.f32.mrb[9].mxu0 }
 0x30f   : > { %v725_v44 = vpop.f32.mrb[10].mxu0 }
 0x310   : > { %v1405_v45 = vpop.f32.mrb[11].mxu0  ;;  %v731_v46 = vsel %vm728_vm5, 0.0, %v1331_v42 }
 0x311   : > { %v732_v47 = vsel %vm560_vm3, %v731_v46, -inf }
 0x312   : > { %733 = vmax.xlane.f32.xlu1 %v732_v47 }
 0x315   : > { %v838_v48 = vpop.f32.mrb[12].mxu0 }
 0x316   : > { %vm844_vm6 = vcmp.ne.f32.partialorder %v838_v48, %v838_v48  ;;  %v1334_v49 = vclamps-f32 %v838_v48, 1e+09  ;;  %v1416_v50 = vpop.f32.mrb[13].mxu0 }
 0x317   : > { %v841_v51 = vpop.f32.mrb[14].mxu0 }
 0x318   : > { %v1417_v52 = vpop.f32.mrb[15].mxu0  ;;  %v847_v53 = vsel %vm844_vm6, 0.0, %v1334_v49  ;;  %v1586_v51 = vld [vmem:[#allocation13] sm:$0xff]  }
 0x319   : > { %v848_v54 = vsel %vm560_vm3, %v847_v53, -inf  ;;  %1437 = vmatpush3.bf16.msra.mxu0 %v1586_v51 }
 0x31a   : > { %849 = vmax.xlane.f32.xlu0 %v848_v54  ;;  %1438 = vmatprep.subr.bf16.mxu0 %v1907_v0 }
 0x31d   : > { %v954_v55 = vpop.f32.mrb[16].mxu0 }
 0x31e   : > { %vm960_vm7 = vcmp.ne.f32.partialorder %v954_v55, %v954_v55  ;;  %v1337_v56 = vclamps-f32 %v954_v55, 1e+09  ;;  %v1428_v57 = vpop.f32.mrb[17].mxu0 }
 0x31f   : > { %v957_v58 = vpop.f32.mrb[18].mxu0 }
 0x320   : > { %v1429_v59 = vpop.f32.mrb[19].mxu0  ;;  %v963_v60 = vsel %vm960_vm7, 0.0, %v1337_v56 }
 0x321   : > { %v964_v61 = vsel %vm560_vm3, %v963_v60, -inf }
 0x322   : > { %965 = vmax.xlane.f32.xlu0 %v964_v61 }
 0x32a   : > { %v613_v62 = vpop.xlane.xlu0 %612 }
 0x32b   : > { %v614_v63 = vsub.f32 %v610_v39, %v613_v62 }
 0x32d   : > { %v615_v1 = vmul.f32 1.442695, %v614_v63 }
 0x32f   : > { %1588 = vpow2.f32 %v615_v1 }
 0x339   : > { %v1589_v2 = vpop.eup %1588 }
 0x33a   : > { %v617_v3 = vsel %vm560_vm3, %v1589_v2, 0.0 }
 0x33b   : > { %618 = vadd.xlane.f32.xlu1 %v617_v3 }
 0x34c   : > { %627 = vrot.lane.b32.xlu1 %v2269_v23, %s1912_s14  ;;  %s2331_s14 = scalar_lea.hbm %s2411_s7, %s1344_s19 }
 0x39f   : > { %v734_v4 = vpop.xlane.xlu1 %733 }
 0x3a0   : > { %v735_v5 = vsub.f32 %v731_v46, %v734_v4 }
 0x3a2   : > { %v736_v6 = vmul.f32 1.442695, %v735_v5 }
 0x3a4   : > { %1590 = vpow2.f32 %v736_v6 }
 0x3a7   : > { %v850_v7 = vpop.xlane.xlu0 %849 }
 0x3a8   : > { %v851_v8 = vsub.f32 %v847_v53, %v850_v7  ;;  %v1587_v53 = vld [vmem:[#allocation13 + $0x8] sm:$0xff]  }
 0x3a9   : > { %1439 = vmatpush3.bf16.msra.mxu0 %v1587_v53 }
 0x3aa   : > { %v852_v9 = vmul.f32 1.442695, %v851_v8 }
 0x3ac   : > { %1592 = vpow2.f32 %v852_v9 }
 0x3ae   : > { %v1591_v10 = vpop.eup %1590 }
 0x3af   : > { %v966_v11 = vpop.xlane.xlu0 %965  ;;  %v738_v12 = vsel %vm560_vm3, %v1591_v10, 0.0 }
 0x3b0   : > { %v967_v13 = vsub.f32 %v963_v60, %v966_v11  ;;  %739 = vadd.xlane.f32.xlu0 %v738_v12 }
 0x3b2   : > { %v968_v14 = vmul.f32 1.442695, %v967_v13 }
 0x3b4   : > { %1594 = vpow2.f32 %v968_v14 }
 0x3b6   : > { %v1593_v15 = vpop.eup %1592 }
 0x3b7   : > { %v854_v16 = vsel %vm560_vm3, %v1593_v15, 0.0 }
 0x3b8   : > { %855 = vadd.xlane.f32.xlu1 %v854_v16 }
 0x3be   : > { %v1595_v17 = vpop.eup %1594 }
 0x3bf   : > { %v970_v18 = vsel %vm560_vm3, %v1595_v17, 0.0 }
 0x3c0   : > { %971 = vadd.xlane.f32.xlu0 %v970_v18 }
 0x3c8   : > { %v619_v19 = vpop.xlane.xlu1 %618 }
 0x3c9   : > { %1596 = vrcp.f32 %v619_v19  ;;  %861 = vrot.lane.b32.xlu1 %v2269_v23, %s1913_s22  ;;  %s1130_s22 = scalar_lea.sflag [#allocation6], %s2232_s1 }
 0x3cc   : > { %v628_v20 = vpop.permute.xlu1 %627 }
 0x3cd   : > { %v634_v21 = vsel %vm632_vm8, %v628_v20, 0  ;;  %977 = vrot.lane.b32.xlu1 %v2269_v23, %s1914_s12  ;;  %s1802_s12 = scalar_lea.vmem %s2333_s18, 128 }
 0x3ce   : > { %1395 = vmatpush3.bf16.msra.mxu1 %v634_v21  ;;  %p1803_p2 = scmp.ne.s32.totalorder %s2333_s18, %s1802_s12 }
 0x3cf   : > { %1406 = vmatprep.subr.bf16.mxu1 %v1907_v0 }
 0x3d0   : > { %p1804_p10 = pnand %p1803_p2, %p2412_p9 }
 0x3d2   : > { %p1805_p1 = pneg %p1804_p10 }
 0x3d3   : > { %v1597_v22 = vpop.eup %1596 }
 0x3d4   : > { %v621_v24 = vmul.f32 %v1597_v22, %v1589_v2 }
 0x3d6   : > { %v622_v25 = vadd.f32 1e-09, %v621_v24  ;;  %745 = vrot.lane.b32.xlu0 %v2269_v23, %s1915_s16  ;;  %s1806_s16 = sshll.u32 %s1919_s27, 4  ;;  %s1807_s16 = int_to_ptr.vmem [resolvable:$false] %s1806_s16 }
 0x3d7   : > { %p1809_p0 = scmp.lt.s32.totalorder %s2333_s18, %s1807_s16 }
 0x3d8   : > { %v623_v26 = vpack.c.bf16 %v622_v25, %v622_v25 }
 0x3da   : > { %1397 = vmatmul.mubr.msk.bf16.vlgmr.msra.gmra.mrb[4].mxu1 %vm560_vm3, %v623_v26 }
 0x3db   : > { %1408 = vmatprep.mubr.msk.bf16.mxu1 %vm1908_vm0, %v1907_v0 }
 0x43d   : > { %v740_v27 = vpop.xlane.xlu0 %739 }
 0x43e   : > { %1598 = vrcp.f32 %v740_v27 }
 0x445   : > { %v856_v28 = vpop.xlane.xlu1 %855 }
 0x446   : > { %1600 = vrcp.f32 %v856_v28 }
 0x448   : > { %v1599_v29 = vpop.eup %1598 }
 0x449   : > { %v742_v30 = vmul.f32 %v1599_v29, %v1591_v10  ;;  %v862_v23 = vpop.permute.xlu1 %861 }
 0x44a   : > { %v867_v38 = vsel %vm632_vm8, %v862_v23, 0 }
 0x44b   : > { %v743_v32 = vadd.f32 1e-09, %v742_v30 }
 0x44d   : > { %v972_v31 = vpop.xlane.xlu0 %971  ;;  %v744_v37 = vpack.c.bf16 %v743_v32, %v743_v32  ;;  %v978_v41 = vpop.permute.xlu1 %977 }
 0x44e   : > { %1602 = vrcp.f32 %v972_v31  ;;  %v983_v44 = vsel %vm632_vm8, %v978_v41, 0 }
 0x450   : > { %v1601_v33 = vpop.eup %1600 }
 0x451   : > { %v746_v34 = vpop.permute.xlu0 %745  ;;  %v858_v36 = vmul.f32 %v1601_v33, %v1593_v15  ;;  %v1342_v15 = vld [vmem:[#allocation15] ss:$0 sm:$0xff] }
 0x452   : > { %v751_v35 = vsel %vm632_vm8, %v746_v34, 0 }
 0x453   : > { %1407 = vmatpush3.bf16.msra.mxu1 %v751_v35  ;;  %v859_v39 = vadd.f32 1e-09, %v858_v36 }
 0x454   : > { %1418 = vmatprep.subr.bf16.mxu1 %v1907_v0 }
 0x455   : > { %v860_v43 = vpack.c.bf16 %v859_v39, %v859_v39 }
 0x456   : > { %1409 = vmatmul.mubr.msk.bf16.vlgmr.msra.gmra.mrb[8].mxu1 %vm560_vm3, %v744_v37 }
 0x457   : > { %1419 = vmatpush3.bf16.msra.mxu1 %v867_v38  ;;  %1420 = vmatprep.mubr.msk.bf16.mxu1 %vm1908_vm0, %v1907_v0 }
 0x458   : > { %1430 = vmatprep.subr.bf16.mxu1 %v1907_v0  ;;  %v1603_v40 = vpop.eup %1602 }
 0x459   : > { %v974_v42 = vmul.f32 %v1603_v40, %v1595_v17 }
 0x45b   : > { %v975_v45 = vadd.f32 1e-09, %v974_v42 }
 0x45d   : > { %v976_v46 = vpack.c.bf16 %v975_v45, %v975_v45 }
 0x45e   : > { %1421 = vmatmul.mubr.msk.bf16.vlgmr.msra.gmra.mrb[12].mxu1 %vm560_vm3, %v860_v43 }
 0x45f   : > { %1431 = vmatpush3.bf16.msra.mxu1 %v983_v44  ;;  %1432 = vmatprep.mubr.msk.bf16.mxu1 %vm1908_vm0, %v1907_v0 }
 0x466   : > { %1433 = vmatmul.mubr.msk.bf16.vlgmr.msra.gmra.mrb[16].mxu1 %vm560_vm3, %v976_v46 }
 0x4ad   : > { %v670_v47 = vpop.f32.mrb[4].mxu1 }
 0x4ae   : > { %v1398_v48 = vpop.f32.mrb[5].mxu1  ;;  %v676_v5 = vpack.c.bf16 %v670_v47, %v670_v47 }
 0x4af   : > { %v673_v49 = vpop.f32.mrb[6].mxu1 }
 0x4b0   : > { %v1399_v50 = vpop.f32.mrb[7].mxu1 }
 0x529   : > { %v787_v52 = vpop.f32.mrb[8].mxu1 }
 0x52a   : > { %v793_v54 = vpack.c.bf16 %v787_v52, %v787_v52  ;;  %v1410_v55 = vpop.f32.mrb[9].mxu1 }
 0x52b   : > { %v790_v56 = vpop.f32.mrb[10].mxu1 }
 0x52c   : > { %1027 = vrot.lane.b32.xlu0 %v793_v54, %s1916_s10  ;;  %v1411_v57 = vpop.f32.mrb[11].mxu1  ;;  %s1808_s10 = scalar_lea.vmem %s1807_s16, 256 }
 0x52d   : > { %p1810_p7 = scmp.lt.s32.totalorder %s1808_s10, %s1802_s12 }
 0x52f   : > { %p1811_p5 = por %p1810_p7, %p1809_p0 }
 0x531   : > { %v903_v58 = vpop.f32.mrb[12].mxu1  ;;  %p1812_p8 = pnand %p1811_p5, %p1805_p1 }
 0x532   : > { %v909_v59 = vpack.c.bf16 %v903_v58, %v903_v58  ;;  %v1422_v60 = vpop.f32.mrb[13].mxu1 }
 0x533   : > { %v906_v61 = vpop.f32.mrb[14].mxu1 }
 0x534   : > { %1030 = vrot.lane.b32.xlu1 %v909_v59, %s1917_s15  ;;  %v1423_v62 = vpop.f32.mrb[15].mxu1 }
 0x539   : > { %v1019_v63 = vpop.f32.mrb[16].mxu1 }
 0x53a   : > { %v1025_v1 = vpack.c.bf16 %v1019_v63, %v1019_v63  ;;  %v1434_v2 = vpop.f32.mrb[17].mxu1 }
 0x53b   : > { %v1022_v3 = vpop.f32.mrb[18].mxu1 }
 0x53c   : > { %1033 = vrot.lane.b32.xlu0 %v1025_v1, %s1918_s13  ;;  %v1435_v0 = vpop.f32.mrb[19].mxu1 }
 0x59e   : > { %v1028_v4 = vpop.permute.xlu0 %1027 }
 0x59f   : > { %v1037_v7 = vsel %vm560_vm3, %v676_v5, %v1028_v4 }
 0x5a6   : > { %v1031_v6 = vpop.permute.xlu1 %1030 }
 0x5a7   : > { %v1040_v8 = vsel %vm1038_vm9, %v1037_v7, %v1031_v6 }
 0x5ae   : > { %v1034_v9 = vpop.permute.xlu0 %1033 }
 0x5af   : > { %v1043_v10 = vsel %vm1041_vm10, %v1040_v8, %v1034_v9 }
 0x5b0   : > { %1441 = vmatmul.mubr.msk.bf16.vlgmr.msra.gmra.mrb[20].mxu0 %vm429_vm1, %v1043_v10 }
 0x683   : > { %v1098_v11 = vpop.f32.mrb[20].mxu0 }
 0x684   : > { %1108 = vst.msk [vmem:[#allocation2] sm:$0xff] %vm429_vm1, %v1098_v11  ;;  %v1442_v12 = vpop.f32.mrb[21].mxu0 }
 0x685   : > { %v1101_v13 = vpop.f32.mrb[22].mxu0 }
 0x686   : > { %v1443_v14 = vpop.f32.mrb[23].mxu0 }
 0x68b   : > { %v1119_v16 = vld [vmem:[#allocation2] sm:$0xff] }
 0x68c   : > { %v1127_v17 = vadd.f32 %v1342_v15, %v1119_v16 }
 0x68e   : > { %1128 = vst.msk [vmem:[%s395_s21] sm:$0xff] %vm429_vm1, %v1127_v17 }
 0x68f   : > { %1815 = shalt.err (!%p1812_p8)
}
 0x690   : > { %s1816_s1 = scalar_lea.hbm %s2331_s14, 128  ;;  %s1820_s11 = scalar_lea.hbm %s2411_s7, 256 }
 0x691   : > { %p1817_p3 = scmp.ne.s32.totalorder %s2331_s14, %s1816_s1  ;;  %p1821_p13 = scmp.lt.u32.totalorder %s2331_s14, %s2411_s7 }
 0x692   : > { %p1822_p12 = scmp.lt.u32.totalorder %s1820_s11, %s1816_s1  ;;  %p1824_p2 = scmp.lt.u32.totalorder %s1816_s1, %s2331_s14 }
 0x693   : > { %p1818_p11 = pnand %p1817_p3, %p2412_p9 }
 0x694   : > { %p1823_p4 = por %p1822_p12, %p1821_p13 }
 0x695   : > { %p1819_p6 = pneg %p1818_p11 }
 0x696   : > { %p1825_p10 = por %p1824_p2, %p1823_p4 }
 0x698   : > { %p1826_p1 = pnand %p1825_p10, %p1819_p6 }
 0x69a   : > { %1829 = shalt.err (!%p1826_p1)
}
 0x69b   : > { %1470 = dma.vmem_to_hbm [thread:$0]  (%p2412_p9), %s2333_s18, 128, %s2331_s14, %s1130_s22  }
 0x69c PF: > { %s1156_s8 = sand.u32 1, %s1876_s24   ;;  %p2413_p0 = scmp.ne.s32.totalorder %s2407_s23, 0 }
 0x69d   : > { %p2414_p7 = scmp.ge.s32.totalorder %s1896_s29, 2  ;;  %s1157_s9 = scalar_lea.sflag [#allocation6], %s1156_s8 }
 0x69f   : > { %p1496_p5 = pnand %p2414_p7, %p2413_p0 }
 0x6a1   : > { %1871 = dma.done.wait (!%p1496_p5), %s1157_s9, 128  }
 0x6a2   : > { %1873 = vsyncadd (!%p1496_p5), %s1157_s9, 4294967168  ;;  %s26_s29 = sadd.s32 1, %s1896_s29   ;;  %s2415_s24 = smov %s1880_s25 }
 0x6a3   : > { %p23_p8 = scmp.ge.s32.totalorder %s26_s29, 4   ;;  %s2416_s25 = smov %s1884_s26 }
 0x6a4   : > { %s2417_s26 = smov %s2182_s20  ;;  %s2418_s27 = smov %s1892_s28 }
 0x6a5   : > { %s2419_s28 = smov %s2421_s17  ;;  %25 = sbr.rel (!%p23_p8) target bundleno = 12 (0xc), region = 141 }
 0x6ac   :  { %1162 = vsyncpa [#allocation5], 1 }
 0x6ad   :  { %1164 = vsyncpa [#allocation5 + $0x1], 1 }
 0x6ae   :  { %1165 = vsyncpa [#allocation8], 1 }
 0x6af   :  { %1166 = vsyncpa [#allocation11], 1 }
 0x6b0   :  { %1167 = vsyncpa [#allocation14], 1 }
 0x6b1   :  { %1168 = vsyncpa [#allocation6], 1 }
 0x6b2   :  { %1170 = vsyncpa [#allocation6 + $0x1], 1 }

</bundles_post_ra>
